<compile_context>
chip_gen: v7x
topology: tpu7x:2x2x1
jax: 0.10.0
libtpu: 0.0.40
codegen_flags: <defaults>
</compile_context>

<pallas_src>
import jax
import jax.numpy as jnp
from jax import lax
from jax.experimental import pallas as pl
from jax.experimental.pallas import tpu as pltpu

EPS = 1e-8
LANE = 128
SUBLANE = 8


# ---------------------------------------------------------------------------
# hardware-aware sizing
# ---------------------------------------------------------------------------
def _round_up(n, m):
    return ((n + m - 1) // m) * m


def _vmem_capacity_bytes():
    try:
        info = pltpu.get_tpu_info()
        cap = int(getattr(info, "vmem_capacity_bytes", 0) or 0)
        if cap > 0:
            return cap
    except Exception:
        pass
    return 64 * 1024 * 1024  # conservative fallback: v7x per-TC VMEM


_VMEM_CAP = _vmem_capacity_bytes()
# Mosaic scoped-VMEM limit: use most of the chip, leave headroom for internals.
VMEM_LIMIT = max(32 * 1024 * 1024,
                 min(_VMEM_CAP - 8 * 1024 * 1024, int(_VMEM_CAP * 7 // 8)))
# What the tile planner is allowed to consume (double-buffered operands + scratch).
TILE_BUDGET = int(_VMEM_CAP * 5 // 8)


def _pick_tm(B, cap=1024):
    """Batch-tile rows: multiple of 8, ~ceil(B/2) so there are >=2 batch tiles
    (shards across v7x's two TensorCores); prefers exact divisors of B so the
    common case needs no row padding."""
    target = min(cap, max(SUBLANE, _round_up((B + 1) // 2, SUBLANE)))
    tm = None
    if B % target == 0:
        tm = target
    else:
        t = target
        while t >= SUBLANE:
            if B % t == 0:
                tm = t
                break
            t -= SUBLANE
        if tm is None:
            tm = target
    Bp = _round_up(B, tm)
    if Bp // tm < 2:  # guarantee >=2 batch tiles (megacore on v7x)
        Bp = 2 * tm
    return tm, Bp


def _pick_tk(tm, Dp, NCp, budget, n_row_f32_ops):
    """Largest K tile (multiple of 128, divisor of Dp) whose working set fits the
    budget. tk == Dp keeps W fully VMEM-resident (fetched once for the grid)."""
    def need(tk):
        return (2 * tm * tk * 4                      # x tile (f32 in), double-buffered
                + 2 * tk * NCp * 2                   # W tile (bf16), double-buffered
                + 2 * NCp * 4                        # bias
                + n_row_f32_ops * 2 * tm * NCp * 4   # y/dfs or rates output
                + tm * NCp * 4                       # f32 accumulator
                + 2 * SUBLANE * LANE * 4)            # partial-sums tile
    tk = Dp
    while tk >= LANE:
        if Dp % tk == 0 and need(tk) <= budget:
            return tk
        tk -= LANE
    return None


def _plan_tiles(B, Dp, NCp, n_row_f32_ops, budget=TILE_BUDGET):
    tm, Bp = _pick_tm(B)
    while True:
        tk = _pick_tk(tm, Dp, NCp, budget, n_row_f32_ops)
        if tk is not None:
            return tm, Bp, tk
        if tm <= SUBLANE:
            return tm, Bp, LANE
        tm = max(SUBLANE, (tm // 2) - ((tm // 2) % SUBLANE))
        Bp = _round_up(B, tm)
        if Bp // tm < 2:
            Bp = 2 * tm


def _pad2d(a, rows, cols):
    pr, pc = rows - a.shape[0], cols - a.shape[1]
    if pr == 0 and pc == 0:
        return a
    return jnp.pad(a, ((0, pr), (0, pc)))


def _softplus(z):
    # numerically stable; exp / log1p land in the EUP slot
    return jnp.maximum(z, 0.0) + jnp.log1p(jnp.exp(-jnp.abs(z)))


# ---------------------------------------------------------------------------
# Kernel 1: LN forward (matmul + bias + softplus)
#   accumulates directly into the resident f32 output block (no scratch).
# ---------------------------------------------------------------------------
def _ln_forward_kernel(x_ref, w_ref, b_ref, out_ref):
    k = pl.program_id(1)

    @pl.when(k == 0)
    def _():
        out_ref[...] = jnp.zeros_like(out_ref)

    # bf16 cast happens in-kernel (VPU has slack; kernel is HBM-bound)
    out_ref[...] += jnp.dot(x_ref[...].astype(jnp.bfloat16), w_ref[...],
                            preferred_element_type=jnp.float32)

    @pl.when(k == pl.num_programs(1) - 1)
    def _():
        out_ref[...] = _softplus(out_ref[...] + b_ref[...])


def ln_forward(x_flat, w_pad_bf16, b_pad_f32):
    """softplus(x @ W + b); W/b already padded (Dp, NCp) bf16 / (1, NCp) f32.
    Returns padded (Bp, NCp) f32 rates; caller slices."""
    B, D = x_flat.shape
    Dp, NCp = w_pad_bf16.shape
    tm, Bp, tk = _plan_tiles(B, Dp, NCp, n_row_f32_ops=1)
    n_i, n_k = Bp // tm, Dp // tk

    xf = _pad2d(x_flat.astype(jnp.float32), Bp, Dp)

    cost = pl.CostEstimate(
        flops=2 * Bp * Dp * NCp,
        transcendentals=2 * Bp * NCp,
        bytes_accessed=(Bp * Dp * 4
                        + (1 if n_k == 1 else n_i) * Dp * NCp * 2
                        + Bp * NCp * 4),
    )

    return pl.pallas_call(
        _ln_forward_kernel,
        out_shape=jax.ShapeDtypeStruct((Bp, NCp), jnp.float32),
        grid_spec=pltpu.PrefetchScalarGridSpec(
            num_scalar_prefetch=0,
            grid=(n_i, n_k),
            in_specs=[
                pl.BlockSpec((tm, tk), lambda i, k: (i, k)),   # x (f32)
                pl.BlockSpec((tk, NCp), lambda i, k: (k, 0)),  # W (bf16, resident if n_k==1)
                pl.BlockSpec((1, NCp), lambda i, k: (0, 0)),   # b
            ],
            out_specs=pl.BlockSpec((tm, NCp), lambda i, k: (i, 0)),
        ),
        compiler_params=pltpu.CompilerParams(
            dimension_semantics=("parallel", "arbitrary"),
            vmem_limit_bytes=VMEM_LIMIT,
        ),
        cost_estimate=cost,
    )(xf, w_pad_bf16, b_pad_f32)


# ---------------------------------------------------------------------------
# Kernel 2: fused training/validation step
#   rates = softplus(x @ W + b); num = sum(dfs * nll); den = sum(dfs)
#   per-batch-tile partials land in a lane-dense (8,128) tile:
#   lane0 = num, lane1 = den; final scalars reduced in JAX.
# ---------------------------------------------------------------------------
def _fused_step_kernel(x_ref, w_ref, b_ref, y_ref, dfs_ref, out_ref, acc_ref):
    k = pl.program_id(1)

    @pl.when(k == 0)
    def _():
        acc_ref[...] = jnp.zeros_like(acc_ref)

    acc_ref[...] += jnp.dot(x_ref[...].astype(jnp.bfloat16), w_ref[...],
                            preferred_element_type=jnp.float32)

    @pl.when(k == pl.num_programs(1) - 1)
    def _():
        z = acc_ref[...] + b_ref[...]
        y_hat = _softplus(z)
        dfs = dfs_ref[...]                            # padded rows/lanes have dfs == 0
        nll = y_hat - y_ref[...] * jnp.log(y_hat + EPS)
        num = jnp.sum(dfs * nll)
        den = jnp.sum(dfs)
        lane = lax.broadcasted_iota(jnp.int32, out_ref.shape, out_ref.ndim - 1)
        out_ref[...] = jnp.where(lane == 0, num,
                                 jnp.where(lane == 1, den, 0.0))


def fused_ln_poisson_loss(x_flat, w_pad_bf16, b_pad_f32, y, dfs):
    """Datafilter-weighted Poisson NLL of the LN encoder in one fused pass."""
    B, D = x_flat.shape
    Dp, NCp = w_pad_bf16.shape
    tm, Bp, tk = _plan_tiles(B, Dp, NCp, n_row_f32_ops=2)
    n_i, n_k = Bp // tm, Dp // tk

    xf = _pad2d(x_flat.astype(jnp.float32), Bp, Dp)
    yf = _pad2d(y.astype(jnp.float32), Bp, NCp)
    df = _pad2d(dfs.astype(jnp.float32), Bp, NCp)

    cost = pl.CostEstimate(
        flops=2 * Bp * Dp * NCp,
        transcendentals=3 * Bp * NCp,
        bytes_accessed=(Bp * Dp * 4
                        + (1 if n_k == 1 else n_i) * Dp * NCp * 2
                        + 2 * Bp * NCp * 4
                        + n_i * SUBLANE * LANE * 4),
    )

    partials = pl.pallas_call(
        _fused_step_kernel,
        out_shape=jax.ShapeDtypeStruct((n_i, SUBLANE, LANE), jnp.float32),
        grid_spec=pltpu.PrefetchScalarGridSpec(
            num_scalar_prefetch=0,
            grid=(n_i, n_k),
            in_specs=[
                pl.BlockSpec((tm, tk), lambda i, k: (i, k)),   # x (f32)
                pl.BlockSpec((tk, NCp), lambda i, k: (k, 0)),  # W (bf16, resident if n_k==1)
                pl.BlockSpec((1, NCp), lambda i, k: (0, 0)),   # b
                pl.BlockSpec((tm, NCp), lambda i, k: (i, 0)),  # y (robs)
                pl.BlockSpec((tm, NCp), lambda i, k: (i, 0)),  # dfs
            ],
            out_specs=pl.BlockSpec((1, SUBLANE, LANE), lambda i, k: (i, 0, 0)),
            scratch_shapes=[pltpu.VMEM((tm, NCp), jnp.float32)],
        ),
        compiler_params=pltpu.CompilerParams(
            dimension_semantics=("parallel", "arbitrary"),
            vmem_limit_bytes=VMEM_LIMIT,
        ),
        cost_estimate=cost,
    )(xf, w_pad_bf16, b_pad_f32, yf, df)

    num = jnp.sum(partials[:, 0, 0])
    den = jnp.sum(partials[:, 0, 1])
    return num / jnp.maximum(den, 1.0)


# ---------------------------------------------------------------------------
# Kernel 3: standalone PoissonLoss_datafilter (fallback for non-LN models)
# ---------------------------------------------------------------------------
def _poisson_df_loss_kernel(yhat_ref, y_ref, dfs_ref, out_ref):
    y_hat = yhat_ref[...]
    dfs = dfs_ref[...]
    nll = y_hat - y_ref[...] * jnp.log(y_hat + EPS)
    lane = lax.broadcasted_iota(jnp.int32, out_ref.shape, out_ref.ndim - 1)
    out_ref[...] = jnp.where(lane == 0, jnp.sum(dfs * nll),
                             jnp.where(lane == 1, jnp.sum(dfs), 0.0))


def poisson_loss_datafilter(y_hat, y, dfs=None):
    """Datafilter-weighted Poisson NLL (scalar)."""
    if dfs is None:
        dfs = jnp.ones_like(y_hat)
    B, NC = y_hat.shape
    NCp = _round_up(max(NC, LANE), LANE)
    tm = min(2048, _round_up(B, SUBLANE))   # big tiles: purely HBM-bound reduce
    Bp = _round_up(B, tm)
    n_i = Bp // tm

    yh = _pad2d(y_hat.astype(jnp.float32), Bp, NCp)
    yv = _pad2d(y.astype(jnp.float32), Bp, NCp)
    df = _pad2d(dfs.astype(jnp.float32), Bp, NCp)   # padded rows/lanes -> dfs == 0

    partials = pl.pallas_call(
        _poisson_df_loss_kernel,
        out_shape=jax.ShapeDtypeStruct((n_i, SUBLANE, LANE), jnp.float32),
        grid_spec=pltpu.PrefetchScalarGridSpec(
            num_scalar_prefetch=0,
            grid=(n_i,),
            in_specs=[pl.BlockSpec((tm, NCp), lambda i: (i, 0))] * 3,
            out_specs=pl.BlockSpec((1, SUBLANE, LANE), lambda i: (i, 0, 0)),
        ),
        compiler_params=pltpu.CompilerParams(
            dimension_semantics=("parallel",),
            vmem_limit_bytes=VMEM_LIMIT,
        ),
    )(yh, yv, df)
    num = jnp.sum(partials[:, 0, 0])
    den = jnp.sum(partials[:, 0, 1])
    return num / jnp.maximum(den, 1.0)


# ---------------------------------------------------------------------------
# Synthetic wrapped model (the `model` argument of ModelWrapper)
# ---------------------------------------------------------------------------
class LNEncoder:
    def __init__(self, key, d_in, cids, reg_lambda=1e-4):
        self.cids = cids
        self.name = "ln_encoder"
        nc = int(len(cids))
        self.d_in = d_in
        self.nc = nc
        self.ncp = _round_up(max(nc, LANE), LANE)   # lane-padded neuron axis
        self.dp = _round_up(d_in, LANE)             # lane-padded stim axis
        k1, _ = jax.random.split(key)
        self.w = jax.random.normal(k1, (d_in, nc), jnp.float32) * 0.01
        self.b = jnp.zeros((nc,), jnp.float32)
        self.reg_lambda = reg_lambda
        self._normalize_reg = False
        self.refresh_padded_params()

    def refresh_padded_params(self):
        # cached once (not re-cast/re-padded every step)
        # TODO(synk): a real optimizer step would call this after updating w/b.
        self.w_pad_bf16 = _pad2d(self.w, self.dp, self.ncp).astype(jnp.bfloat16)
        self.b_pad_f32 = _pad2d(self.b.reshape(1, self.nc), 1, self.ncp).astype(jnp.float32)

    def flatten_stim(self, batch):
        stim = batch["stim"]                         # NCHW
        return stim.reshape(stim.shape[0], -1).astype(jnp.float32)

    def __call__(self, batch):
        x_flat = self.flatten_stim(batch)
        rates = ln_forward(x_flat, self.w_pad_bf16, self.b_pad_f32)
        return rates[: x_flat.shape[0], : self.nc]

    def prepare_regularization(self, normalize_reg=False):
        self._normalize_reg = normalize_reg

    def compute_reg_loss(self):
        # exact f32 L2 on the real weights; tiny reduction, XLA fuses it
        reg = self.reg_lambda * jnp.sum(self.w * self.w)
        if self._normalize_reg:
            reg = reg / float(self.w.size)
        return reg


# ---------------------------------------------------------------------------
# ModelWrapper — mirrors the PyTorch wrapper's API / forward semantics
# ---------------------------------------------------------------------------
class ModelWrapper:
    # TODO(synk): PoissonLoss_datafilter config knobs (per-unit weighting / 'mean'
    # reduction variants) are not modeled; only the default df-weighted sum/sum.
    def __init__(self, model, loss=poisson_loss_datafilter, cids=None):
        self.cids = model.cids if cids is None else cids
        self.model = model
        self.name = getattr(model, "name", "unnamed")
        self.loss = loss

    def compute_reg_loss(self):
        return self.model.compute_reg_loss()

    def prepare_regularization(self, normalize_reg=False):
        self.model.prepare_regularization(normalize_reg=normalize_reg)

    def forward(self, batch):
        return self.model(batch)

    __call__ = forward

    # ---- fused forward+loss path ------------------------------------------
    def _can_fuse(self):
        return (self.loss is poisson_loss_datafilter
                and hasattr(self.model, "flatten_stim")
                and hasattr(self.model, "w_pad_bf16"))

    def _fused_loss(self, batch):
        m = self.model
        x_flat = m.flatten_stim(batch)
        y = batch["robs"][:, self.cids]
        dfs = batch["dfs"][:, self.cids] if "dfs" in batch else jnp.ones_like(y)
        return fused_ln_poisson_loss(x_flat, m.w_pad_bf16, m.b_pad_f32, y, dfs)

    def _unfused_loss(self, batch):
        y = batch["robs"][:, self.cids]
        y_hat = self(batch)
        if "dfs" in batch:
            return self.loss(y_hat, y, batch["dfs"][:, self.cids])
        return self.loss(y_hat, y)

    def training_step(self, batch, batch_idx=None):
        loss = self._fused_loss(batch) if self._can_fuse() else self._unfused_loss(batch)
        regularizers = self.compute_reg_loss()
        return {"loss": loss + regularizers, "train_loss": loss,
                "reg_loss": regularizers}

    def validation_step(self, batch, batch_idx=None):
        loss = self._fused_loss(batch) if self._can_fuse() else self._unfused_loss(batch)
        return {"loss": loss, "val_loss": loss, "reg_loss": None}


# ---------------------------------------------------------------------------
# Demo
# ---------------------------------------------------------------------------
if __name__ == "__main__":
    key = jax.random.PRNGKey(0)
    k_stim, k_robs, k_dfs, k_model = jax.random.split(key, 4)

    B, C, H, W = 2, 4, 16, 16          # NCHW stimulus
    N_TOTAL, NC = 48, 32               # total recorded units, modeled units
    cids = jnp.arange(NC)

    stim = jax.random.normal(k_stim, (B, C, H, W), jnp.float32)
    robs = jax.random.poisson(k_robs, 1.0, (B, N_TOTAL)).astype(jnp.float32)
    dfs = (jax.random.uniform(k_dfs, (B, N_TOTAL)) > 0.1).astype(jnp.float32)

    batch = {"stim": stim, "robs": robs, "dfs": dfs}

    model = LNEncoder(k_model, d_in=C * H * W, cids=cids)
    wrapper = ModelWrapper(model)
    wrapper.prepare_regularization(normalize_reg=False)

    y_hat = wrapper.forward(batch)
    train_out = wrapper.training_step(batch)
    val_out = wrapper.validation_step(batch)
    standalone_loss = poisson_loss_datafilter(y_hat, robs[:, :NC], dfs[:, :NC])

    jax.block_until_ready(y_hat)
    jax.block_until_ready(train_out["loss"])
    jax.block_until_ready(train_out["train_loss"])
    jax.block_until_ready(train_out["reg_loss"])
    jax.block_until_ready(val_out["loss"])
    jax.block_until_ready(standalone_loss)

    # --- sanity checks against a plain-JAX reference (bf16 MXU tolerance) ---
    x_flat = stim.reshape(B, -1)
    yhat_ref = jax.nn.softplus(x_flat @ model.w + model.b)
    y_sel = robs[:, :NC]
    dfs_sel = dfs[:, :NC]
    nll_ref = yhat_ref - y_sel * jnp.log(yhat_ref + EPS)
    loss_ref = jnp.sum(dfs_sel * nll_ref) / jnp.maximum(jnp.sum(dfs_sel), 1.0)
    reg_ref = model.reg_lambda * jnp.sum(model.w * model.w)

    assert y_hat.shape == (B, NC)
    assert jnp.allclose(y_hat, yhat_ref, rtol=2e-2, atol=2e-3)
    assert jnp.allclose(train_out["train_loss"], loss_ref, rtol=2e-2, atol=2e-3)
    assert jnp.allclose(val_out["val_loss"], loss_ref, rtol=2e-2, atol=2e-3)
    assert jnp.allclose(train_out["reg_loss"], reg_ref, rtol=1e-5, atol=1e-8)
    assert jnp.isfinite(standalone_loss)
    print("KERNEL_OK")
</pallas_src>

<mosaic_0001>
module attributes {stable_mosaic.version = 11 : i64} {
  func.func @_ln_forward_kernel(%arg0: i32, %arg1: i32, %arg2: memref<8x1024xf32, #tpu.memory_space<vmem>>, %arg3: memref<1024x128xbf16, #tpu.memory_space<vmem>>, %arg4: memref<1x128xf32, #tpu.memory_space<vmem>>, %arg5: memref<8x128xf32, #tpu.memory_space<vmem>>) attributes {dimension_semantics = [#tpu.dimension_semantics<parallel>, #tpu.dimension_semantics<arbitrary>], iteration_bounds = array<i64: 2, 1>, scalar_prefetch = 0 : i64, scratch_operands = 0 : i64, tpu.core_type = #tpu.core_type<tc>, window_params = [{transform_indices = @transform_0, window_bounds = array<i64: 8, 1024>}, {transform_indices = @transform_1, window_bounds = array<i64: 1024, 128>}, {pipeline_mode = #tpu.pipeline_mode<synchronous>, transform_indices = @transform_2, window_bounds = array<i64: 1, 128>}, {transform_indices = @transform_3, window_bounds = array<i64: 8, 128>}]} {
    %c0_i32 = arith.constant 0 : i32
    %0 = arith.cmpi eq, %arg1, %c0_i32 : i32
    %1 = arith.extui %0 : i1 to i32
    %c0_i32_0 = arith.constant 0 : i32
    %2 = arith.cmpi ne, %1, %c0_i32_0 : i32
    scf.if %2 {
      %cst_10 = arith.constant 0.000000e+00 : f32
      %13 = vector.broadcast %cst_10 : f32 to vector<8x128xf32>
      %c0_11 = arith.constant 0 : index
      %c0_12 = arith.constant 0 : index
      %14 = vector.load %arg5[%c0_11, %c0_12] : memref<8x128xf32, #tpu.memory_space<vmem>>, vector<8x128xf32>
      tpu.vector_store %arg5[%c0_11, %c0_12], %13 {strides = array<i32>} : memref<8x128xf32, #tpu.memory_space<vmem>>, vector<8x128xf32>,
    } else {
    }
    %c0 = arith.constant 0 : index
    %c0_1 = arith.constant 0 : index
    %3 = vector.load %arg5[%c0, %c0_1] : memref<8x128xf32, #tpu.memory_space<vmem>>, vector<8x128xf32>
    %c0_2 = arith.constant 0 : index
    %c0_3 = arith.constant 0 : index
    %4 = vector.load %arg2[%c0_2, %c0_3] : memref<8x1024xf32, #tpu.memory_space<vmem>>, vector<8x1024xf32>
    %5 = arith.truncf %4 : vector<8x1024xf32> to vector<8x1024xbf16>
    %c0_4 = arith.constant 0 : index
    %c0_5 = arith.constant 0 : index
    %6 = vector.load %arg3[%c0_4, %c0_5] : memref<1024x128xbf16, #tpu.memory_space<vmem>>, vector<1024x128xbf16>
    %cst = arith.constant dense<0.000000e+00> : vector<8x128xf32>
    %7 = tpu.matmul %5, %6, %cst {dimension_numbers = #tpu.dot_dimension_numbers<[1], [0], [0], [1], [0, 0, 1, 1], [], []>} : vector<8x1024xbf16>, vector<1024x128xbf16>, vector<8x128xf32> -> vector<8x128xf32>
    %8 = arith.addf %3, %7 : vector<8x128xf32>
    %c0_6 = arith.constant 0 : index
    %c0_7 = arith.constant 0 : index
    %9 = vector.load %arg5[%c0_6, %c0_7] : memref<8x128xf32, #tpu.memory_space<vmem>>, vector<8x128xf32>
    tpu.vector_store %arg5[%c0_6, %c0_7], %8 {strides = array<i32>} : memref<8x128xf32, #tpu.memory_space<vmem>>, vector<8x128xf32>,
    %c0_i32_8 = arith.constant 0 : i32
    %10 = arith.cmpi eq, %arg1, %c0_i32_8 : i32
    %11 = arith.extui %10 : i1 to i32
    %c0_i32_9 = arith.constant 0 : i32
    %12 = arith.cmpi ne, %11, %c0_i32_9 : i32
    scf.if %12 {
      %c0_10 = arith.constant 0 : index
      %c0_11 = arith.constant 0 : index
      %13 = vector.load %arg5[%c0_10, %c0_11] : memref<8x128xf32, #tpu.memory_space<vmem>>, vector<8x128xf32>
      %c0_12 = arith.constant 0 : index
      %c0_13 = arith.constant 0 : index
      %14 = vector.load %arg4[%c0_12, %c0_13] : memref<1x128xf32, #tpu.memory_space<vmem>>, vector<1x128xf32>
      %15 = vector.broadcast %14 : vector<1x128xf32> to vector<8x128xf32>
      %16 = arith.addf %13, %15 : vector<8x128xf32>
      %cst_14 = arith.constant 0.000000e+00 : f32
      %17 = vector.broadcast %cst_14 : f32 to vector<8x128xf32>
      %18 = arith.maximumf %16, %17 : vector<8x128xf32>
      %19 = math.absf %16 : vector<8x128xf32>
      %cst_15 = arith.constant 0.000000e+00 : f32
      %20 = vector.broadcast %cst_15 : f32 to vector<8x128xf32>
      %21 = arith.subf %20, %19 : vector<8x128xf32>
      %22 = math.exp %21 : vector<8x128xf32>
      %23 = math.log1p %22 : vector<8x128xf32>
      %24 = arith.addf %18, %23 : vector<8x128xf32>
      %c0_16 = arith.constant 0 : index
      %c0_17 = arith.constant 0 : index
      %25 = vector.load %arg5[%c0_16, %c0_17] : memref<8x128xf32, #tpu.memory_space<vmem>>, vector<8x128xf32>
      tpu.vector_store %arg5[%c0_16, %c0_17], %24 {strides = array<i32>} : memref<8x128xf32, #tpu.memory_space<vmem>>, vector<8x128xf32>,
    } else {
    }
    return
  }
  func.func @transform_0(%arg0: i32, %arg1: i32) -> (i32, i32) {
    %c0_i32 = arith.constant 0 : i32
    return %arg0, %arg1 : i32, i32
  }
  func.func @transform_1(%arg0: i32, %arg1: i32) -> (i32, i32) {
    %c0_i32 = arith.constant 0 : i32
    %c0_i32_0 = arith.constant 0 : i32
    return %arg1, %c0_i32 : i32, i32
  }
  func.func @transform_2(%arg0: i32, %arg1: i32) -> (i32, i32) {
    %c0_i32 = arith.constant 0 : i32
    %c0_i32_0 = arith.constant 0 : i32
    %c0_i32_1 = arith.constant 0 : i32
    return %c0_i32, %c0_i32_0 : i32, i32
  }
  func.func @transform_3(%arg0: i32, %arg1: i32) -> (i32, i32) {
    %c0_i32 = arith.constant 0 : i32
    %c0_i32_0 = arith.constant 0 : i32
    return %arg0, %c0_i32 : i32, i32
  }
}

</mosaic_0001>

<bundles_post_ra>
// kernel: tpu_custom_call.1
= control target key start
LH: loop header
LB: loop body
LE: loop exit
PB: predicated region body
PF: predicated region fallthrough
CT: control target
= control target key end

     0   :  { %8 = vsyncpa [#allocation3], 0  ;;  %s1773_s0 = inlined_call_operand.hbm [shape: f32[16,1024], index: 0, kind: input, shape index: {}]   ;;  %s1774_s1 = inlined_call_operand.hbm [shape: bf16[1024,128], index: 1, kind: input, shape index: {}]   ;;  %s1775_s2 = inlined_call_operand.vmem [shape: f32[1,128], index: 2, kind: input, shape index: {}]   ;;  %s1776_s3 = inlined_call_operand.hbm [shape: f32[16,128], index: 3, kind: output, shape index: {}]  }
   0x1   :  { %10 = vsyncpa [#allocation3 + $0x1], 0 }
   0x2   :  { %11 = vsyncpa [#allocation6], 0 }
   0x3   :  { %12 = vsyncpa [#allocation4], 0 }
   0x4   :  { %14 = vsyncpa [#allocation4 + $0x1], 0  ;;  %s1545_s12 = smov 0   ;;  %s1547_s13 = smov 0  }
   0x5   :  { %s1549_s14 = smov 0   ;;  %s1551_s15 = smov 0  }
   0x6   :  { %s1553_s16 = smov 0   ;;  %s1555_s17 = smov 0  }
   0x7 LB: > { %s1060_s18 = sadd.s32 4294967295, %s1518_s17   ;;  %s1061_s19 = sadd.s32 4294967294, %s1518_s17   ;;  %s1518_s17 = sphi %s1555_s17, %s20_s17   ;;  %s1514_s16 = sphi %s1553_s16, %s1800_s16   ;;  %s1510_s15 = sphi %s1551_s15, %s1799_s15   ;;  %s1506_s14 = sphi %s1549_s14, %s1798_s14   ;;  %s1502_s13 = sphi %s1547_s13, %s1797_s13   ;;  %s1498_s12 = sphi %s1545_s12, %s1796_s12  }
   0x8   : > { %p54_p0 = scmp.ne.s32.totalorder %s1502_s13, %s1498_s12  ;;  %p1579_p1 = scmp.eq.s32.totalorder %s1060_s18, 0 }
   0x9   : > { %p1583_p2 = scmp.eq.s32.totalorder %s1060_s18, 1  ;;  %p131_p3 = scmp.eq.s32.totalorder %s1061_s19, 1 }
   0xa   : > { %s1781_s20 = scalar_select %p1579_p1, 1, 0 }
   0xb   : > { %s1782_s21 = scalar_select %p1583_p2, 1, 0 }
   0xc   : > { %p1589_p4 = por %p1579_p1, %p54_p0  ;;  %p1062_p5 = scmp.ge.s32.totalorder %s1518_s17, 1 }
   0xd   : > { %p1594_p6 = por %p131_p3, %p54_p0  ;;  %p138_p7 = scmp.lt.s32.totalorder %s1518_s17, 3 }
   0xe   : > { %s1783_s22 = scalar_select %p1589_p4, 1, 0 }
   0xf   : > { %s1784_s23 = scalar_select %p1594_p6, 1, 0 }
  0x10   : > { %p1599_p8 = pnand %p1062_p5, %p138_p7  ;;  %s1520_s25 = smov [#allocation5]  }
  0x11   : > { %s153_s26 = sshll.u32 %s1520_s25, 4  ;;  %s32_s28 = sadd.s32 1, %s1514_s16  ;;  %s154_s26 = int_to_ptr.vmem [resolvable:$true] %s153_s26 }
  0x12   : > { %s1785_s24 = scalar_select %p1599_p8, 1, 0 }
  0x13   : > { %p1238_p9 = pneg %p1599_p8  ;;  %s1374_s4 = scalar_lea.hbm %s1774_s1, 8192 }
  0x14   : > { %p1375_p12 = scmp.ne.s32.totalorder %s1774_s1, %s1374_s4  ;;  %p1381_p5 = scmp.lt.u32.totalorder %s1374_s4, %s1774_s1 }
  0x15   : > { %p1608_p11 = pnand %p1238_p9, %p1579_p1 }
  0x17   : > { %p1376_p13 = pneg %p1608_p11 }
  0x19   : > { %p1377_p0 = pnand %p1376_p13, %p1375_p12 }
  0x1b   : > { %p1378_p3 = pneg %p1377_p0 }
  0x1d   : > { %p1383_p7 = pnand %p1381_p5, %p1378_p3 }
  0x1f   : > { %1386 = shalt.err (!%p1383_p7)
}
  0x20   : > { %s1387_s9 = scalar_lea.vmem %s154_s26, 8192  ;;  %p1395_p1 = scmp.lt.s32.totalorder %s154_s26, %s154_s26 }
  0x21   : > { %p1388_p9 = scmp.ne.s32.totalorder %s154_s26, %s1387_s9  ;;  %p1396_p4 = scmp.lt.s32.totalorder %s1387_s9, %s1387_s9 }
  0x23   : > { %p1390_p10 = pnand %p1388_p9, %p1376_p13  ;;  %p1397_p8 = por %p1396_p4, %p1395_p1 }
  0x25   : > { %p1391_p6 = pneg %p1390_p10 }
  0x27   : > { %p1398_p2 = pnand %p1397_p8, %p1391_p6 }
  0x29   : > { %1401 = shalt.err (!%p1398_p2)
}
  0x2a   : > { %s1521_s10 = smov 64   ;;  %s1522_s11 = smov 4  }
  0x2b   : > { %1241 = dma.hbm_to_vmem [thread:$0]  (!%p1608_p11), %s1774_s1, 8192, %s154_s26, [#allocation6], %s1521_s10, %s1521_s10, %s1522_s11  }
  0x2c   : > { %p34_p1 = scmp.ge.s32.totalorder %s32_s28, 2  ;;  %s41_s25 = sadd.s32 1, %s1506_s14 }
  0x2d   : > { %p48_p2 = scmp.ne.s32.totalorder %s1506_s14, %s1502_s13  ;;  %p49_p4 = scmp.eq.s32.totalorder %s1518_s17, 0 }
  0x2e   : > { %s1802_s28 = smov (%p34_p1, %s32_s28), 0  ;;  %p1788_p8 = scmp.ne.s32.totalorder %s1782_s21, 0 }
  0x2f   : > { %p1635_p6 = por %p49_p4, %p48_p2  ;;  %s36_s27 = ssub.s32 %s1514_s16, %s1802_s28 }
  0x30   : > { %p1641_p10 = por %p1788_p8, %p48_p2  ;;  %p1251_p12 = scmp.lt.s32.totalorder %s1518_s17, 2 }
  0x31   : > { %p39_p11 = scmp.eq.s32.totalorder %s36_s27, 0  ;;  %s170_s26 = sand.u32 1, %s1506_s14  }
  0x32   : > { %s1065_s4 = sshll.u32 %s170_s26, 6  ;;  %s1141_s6 = sshll.u32 %s1514_s16, 10 }
  0x33   : > { %s1650_s5 = scalar_select %p39_p11, %s1506_s14, %s41_s25  }
  0x34   : > { %s1656_s9 = scalar_lea.hbm %s1773_s0, %s1141_s6  ;;  %s174_s21 = scalar_lea.vmem [#allocation2], %s1065_s4 }
  0x35   : > { %s184_s10 = sshll.u32 %s174_s21, 4  ;;  %p1662_p13 = pnand %p1251_p12, %p1635_p6  ;;  %s1658_s10 = int_to_ptr.vmem [resolvable:$true] %s184_s10 }
  0x36   : > { %s171_s18 = scalar_lea.sflag [#allocation3], %s170_s26  ;;  %s1402_s19 = scalar_lea.hbm %s1656_s9, 1024 }
  0x37   : > { %p1403_p0 = scmp.ne.s32.totalorder %s1656_s9, %s1402_s19  ;;  %p1404_p3 = pneg %p1662_p13 }
  0x38   : > { %s1407_s4 = scalar_lea.hbm %s1773_s0, 2048  ;;  %p1408_p9 = scmp.lt.u32.totalorder %s1656_s9, %s1773_s0 }
  0x39   : > { %p1405_p5 = pnand %p1404_p3, %p1403_p0  ;;  %p1409_p1 = scmp.lt.u32.totalorder %s1407_s4, %s1402_s19 }
  0x3a   : > { %p1411_p4 = scmp.lt.u32.totalorder %s1402_s19, %s1656_s9 }
  0x3b   : > { %p1406_p7 = pneg %p1405_p5  ;;  %p1410_p2 = por %p1409_p1, %p1408_p9 }
  0x3d   : > { %p1412_p6 = por %p1411_p4, %p1410_p2 }
  0x3f   : > { %p1413_p8 = pnand %p1412_p6, %p1406_p7 }
  0x41   : > { %1416 = shalt.err (!%p1413_p8)
}
  0x42   : > { %s1417_s26 = scalar_lea.vmem %s1658_s10, 1024  ;;  %s1523_s7 = smov [#allocation2]  }
  0x43   : > { %p1418_p12 = scmp.ne.s32.totalorder %s1658_s10, %s1417_s26  ;;  %s1422_s8 = sshll.u32 %s1523_s7, 4  ;;  %s1423_s8 = int_to_ptr.vmem [resolvable:$false] %s1422_s8 }
  0x44   : > { %s1424_s21 = scalar_lea.vmem %s1423_s8, 2048  ;;  %p1425_p5 = scmp.lt.s32.totalorder %s1658_s10, %s1423_s8 }
  0x45   : > { %p1420_p11 = pnand %p1418_p12, %p1404_p3  ;;  %p1426_p9 = scmp.lt.s32.totalorder %s1424_s21, %s1417_s26 }
  0x47   : > { %p1421_p0 = pneg %p1420_p11  ;;  %p1427_p1 = por %p1426_p9, %p1425_p5 }
  0x49   : > { %p1428_p2 = pnand %p1427_p1, %p1421_p0 }
  0x4b   : > { %1431 = shalt.err (!%p1428_p2)
}
  0x4c   : > { %1245 = dma.hbm_to_vmem [thread:$0]  (!%p1662_p13), %s1656_s9, 1024, %s1658_s10, %s171_s18  }
  0x4d   : > { %p1791_p7 = scmp.ne.s32.totalorder %s1785_s24, 0 }
  0x4e   : > { %s1694_s19 = sand.u32 (!%p1791_p7), 1, %s1502_s13   ;;  %p1792_p3 = scmp.ne.s32.totalorder (!%p1791_p7), %s1783_s22, 0 }
  0x4f   : > { %193 = sbr.rel (%p1791_p7) target bundleno = 426 (0x1aa), region = 32  ;;  %s1069_s25 = sshll.u32 (!%p1791_p7), %s1694_s19, 6 }
  0x50   : > { %s196_s27 = scalar_lea.sflag (!%p1791_p7), [#allocation3], %s1694_s19  ;;  %s1698_s4 = scalar_lea.vmem (!%p1791_p7), [#allocation2], %s1069_s25 }
  0x56   : > { %1485 = dma.done.wait (%p1792_p3), %s196_s27, 1024  }
  0x57   : > { %1487 = vsyncadd (%p1792_p3), %s196_s27, 4294966272  ;;  %p1793_p13 = scmp.ne.s32.totalorder %s1781_s20, 0 }
  0x59   : > { %1489 = dma.done.wait (%p1793_p13), [#allocation6], 8192  }
  0x5a   : > { %1491 = vsyncadd (%p1793_p13), [#allocation6], 4294959104  ;;  %v1306_v0 = vld [vmem:[#allocation5 + $0x40] sm:$0xff]   ;;  %v1310_v4 = vld [vmem:[#allocation5 + $0x48] sm:$0xff]   ;;  %s1071_s24 = sshll.u32 %s1694_s19, 3  ;;  %s1138_s9 = sshll.u32 %s1510_s15, 7 }
  0x5b   : > { %v1307_v1 = vld [vmem:[#allocation5 + $0xc0] sm:$0xff]   ;;  %1142 = vmatprep.subr.bf16.mxu0 %v1306_v0  ;;  %v1311_v5 = vld [vmem:[#allocation5 + $0xc8] sm:$0xff]   ;;  %v1314_v8 = vld [vmem:[#allocation5 + $0x50] sm:$0xff]   ;;  %s225_s10 = scalar_lea.vmem [#allocation7], %s1071_s24  ;;  %s1724_s6 = scalar_lea.hbm %s1776_s3, %s1138_s9 }
  0x5c   : > { %v1308_v2 = vld [vmem:[#allocation5] sm:$0xff]   ;;  %1164 = vmatprep.subr.bf16.mxu1 %v1307_v1  ;;  %v1312_v6 = vld [vmem:[#allocation5 + $0x8] sm:$0xff]   ;;  %v1315_v9 = vld [vmem:[#allocation5 + $0xd0] sm:$0xff]   ;;  %s967_s11 = sshll.u32 %s225_s10, 4  ;;  %s954_s26 = scalar_lea.sflag [#allocation4], %s1694_s19  ;;  %s1726_s11 = int_to_ptr.vmem [resolvable:$true] %s967_s11 }
  0x5d   : > { %v1309_v3 = vld [vmem:[#allocation5 + $0x80] sm:$0xff]   ;;  %1143 = vmatpush3.bf16.msra.mxu0 %v1308_v2  ;;  %v1313_v7 = vld [vmem:[#allocation5 + $0x88] sm:$0xff]   ;;  %v1316_v10 = vld [vmem:[#allocation5 + $0x10] sm:$0xff]   ;;  %s1432_s7 = scalar_lea.vmem %s1726_s11, 128  ;;  %s1524_s15 = smov [#allocation7]  }
  0x5e   : > { %1165 = vmatpush3.bf16.msra.mxu1 %v1309_v3  ;;  %1144 = vmatprep.subr.bf16.mxu0 %v1310_v4  ;;  %v1317_v11 = vld [vmem:[#allocation5 + $0x90] sm:$0xff]   ;;  %v1318_v12 = vld [vmem:[#allocation5 + $0x58] sm:$0xff]   ;;  %v1322_v16 = vld [vmem:[#allocation5 + $0x60] sm:$0xff]   ;;  %p1433_p4 = scmp.ne.s32.totalorder %s1726_s11, %s1432_s7  ;;  %s1436_s8 = sshll.u32 %s1524_s15, 4  ;;  %s1437_s8 = int_to_ptr.vmem [resolvable:$false] %s1436_s8 }
  0x5f   : > { %1166 = vmatprep.subr.bf16.mxu1 %v1311_v5  ;;  %v1319_v13 = vld [vmem:[#allocation5 + $0xd8] sm:$0xff]   ;;  %v1323_v17 = vld [vmem:[#allocation5 + $0xe0] sm:$0xff]   ;;  %v1326_v20 = vld [vmem:[#allocation5 + $0x68] sm:$0xff]   ;;  %s1438_s21 = scalar_lea.vmem %s1437_s8, 256  ;;  %p1439_p12 = scmp.lt.s32.totalorder %s1726_s11, %s1437_s8 }
  0x60   : > { %v1320_v14 = vld [vmem:[#allocation5 + $0x18] sm:$0xff]   ;;  %v1324_v18 = vld [vmem:[#allocation5 + $0x20] sm:$0xff]   ;;  %v1327_v21 = vld [vmem:[#allocation5 + $0xe8] sm:$0xff]   ;;  %p1434_p6 = pnand %p1433_p4, %p1641_p10  ;;  %p1440_p11 = scmp.lt.s32.totalorder %s1438_s21, %s1432_s7 }
  0x61   : > { %1145 = vmatpush3.bf16.msra.mxu0 %v1312_v6  ;;  %v1321_v15 = vld [vmem:[#allocation5 + $0x98] sm:$0xff]   ;;  %v1325_v19 = vld [vmem:[#allocation5 + $0xa0] sm:$0xff]   ;;  %v1328_v22 = vld [vmem:[#allocation5 + $0x28] sm:$0xff]  }
  0x62   : > { %1167 = vmatpush3.bf16.msra.mxu1 %v1313_v7  ;;  %1146 = vmatprep.subr.bf16.mxu0 %v1314_v8  ;;  %v1329_v23 = vld [vmem:[#allocation5 + $0xa8] sm:$0xff]   ;;  %v1330_v24 = vld [vmem:[#allocation5 + $0x70] sm:$0xff]   ;;  %v1334_v28 = vld [vmem:[#allocation5 + $0x78] sm:$0xff]   ;;  %p1435_p8 = pneg %p1434_p6  ;;  %p1441_p0 = por %p1440_p11, %p1439_p12 }
  0x63   : > { %1168 = vmatprep.subr.bf16.mxu1 %v1315_v9  ;;  %v1331_v25 = vld [vmem:[#allocation5 + $0xf0] sm:$0xff]   ;;  %v1335_v29 = vld [vmem:[#allocation5 + $0xf8] sm:$0xff]   ;;  %v236_v32 = vld [vmem:[%s1698_s4 + $0x8] sm:$0xff] }
  0x64   : > { %v1332_v26 = vld [vmem:[#allocation5 + $0x30] sm:$0xff]   ;;  %v1336_v30 = vld [vmem:[#allocation5 + $0x38] sm:$0xff]   ;;  %v235_v34 = vld [vmem:[%s1698_s4] sm:$0xff]  ;;  %v244_v35 = vpack.c.bf16 %v236_v32, %v236_v32  ;;  %p1442_p5 = pnand %p1441_p0, %p1435_p8 }
  0x65   : > { %1147 = vmatpush3.bf16.msra.mxu0 %v1316_v10  ;;  %v1333_v27 = vld [vmem:[#allocation5 + $0xb0] sm:$0xff]   ;;  %v1337_v31 = vld [vmem:[#allocation5 + $0xb8] sm:$0xff]   ;;  %v243_v37 = vpack.c.bf16 %v235_v34, %v235_v34  ;;  %v1338_v40 = vld [vmem:[#allocation5 + $0x140] sm:$0xff]  }
  0x66   : > { %1169 = vmatpush3.bf16.msra.mxu1 %v1317_v11  ;;  %1148 = vmatprep.subr.bf16.mxu0 %v1318_v12  ;;  %v238_v33 = vld [vmem:[%s1698_s4 + $0x18] sm:$0xff]  ;;  %v237_v38 = vld [vmem:[%s1698_s4 + $0x10] sm:$0xff]  ;;  %v1339_v41 = vld [vmem:[#allocation5 + $0x1c0] sm:$0xff]  }
  0x67   : > { %1170 = vmatprep.subr.bf16.mxu1 %v1319_v13  ;;  %v246_v36 = vpack.c.bf16 %v238_v33, %v238_v33  ;;  %v245_v39 = vpack.c.bf16 %v237_v38, %v237_v38  ;;  %795 = vmatprep.mubr.bf16.mxu0 %v244_v35  ;;  %v1340_v42 = vld [vmem:[#allocation5 + $0x100] sm:$0xff]   ;;  %v1342_v44 = vld [vmem:[#allocation5 + $0x148] sm:$0xff]   ;;  %v1346_v48 = vld [vmem:[#allocation5 + $0x150] sm:$0xff]  }
  0x68   : > { %v1341_v43 = vld [vmem:[#allocation5 + $0x180] sm:$0xff]   ;;  %v1343_v45 = vld [vmem:[#allocation5 + $0x1c8] sm:$0xff]   ;;  %v1347_v49 = vld [vmem:[#allocation5 + $0x1d0] sm:$0xff]  }
  0x69   : > { %1149 = vmatpush3.bf16.msra.mxu0 %v1320_v14  ;;  %835 = vmatprep.mubr.bf16.mxu1 %v246_v36  ;;  %v1344_v46 = vld [vmem:[#allocation5 + $0x108] sm:$0xff]   ;;  %v1348_v50 = vld [vmem:[#allocation5 + $0x110] sm:$0xff]   ;;  %v1350_v52 = vld [vmem:[#allocation5 + $0x158] sm:$0xff]  }
  0x6a   : > { %1171 = vmatpush3.bf16.msra.mxu1 %v1321_v15  ;;  %1150 = vmatprep.subr.bf16.mxu0 %v1322_v16  ;;  %v1345_v47 = vld [vmem:[#allocation5 + $0x188] sm:$0xff]   ;;  %v1349_v51 = vld [vmem:[#allocation5 + $0x190] sm:$0xff]   ;;  %v1351_v53 = vld [vmem:[#allocation5 + $0x1d8] sm:$0xff]  }
  0x6b   : > { %1172 = vmatprep.subr.bf16.mxu1 %v1323_v17  ;;  %v1352_v54 = vld [vmem:[#allocation5 + $0x118] sm:$0xff]   ;;  %v1354_v56 = vld [vmem:[#allocation5 + $0x160] sm:$0xff]   ;;  %v1358_v60 = vld [vmem:[#allocation5 + $0x168] sm:$0xff]  }
  0x6c   : > { %v1353_v55 = vld [vmem:[#allocation5 + $0x198] sm:$0xff]   ;;  %v1355_v57 = vld [vmem:[#allocation5 + $0x1e0] sm:$0xff]   ;;  %v1359_v61 = vld [vmem:[#allocation5 + $0x1e8] sm:$0xff]  }
  0x6d   : > { %1151 = vmatpush3.bf16.msra.mxu0 %v1324_v18  ;;  %v1356_v58 = vld [vmem:[#allocation5 + $0x120] sm:$0xff]   ;;  %v1360_v62 = vld [vmem:[#allocation5 + $0x128] sm:$0xff]   ;;  %v1362_v0 = vld [vmem:[#allocation5 + $0x170] sm:$0xff]  }
  0x6e   : > { %1173 = vmatpush3.bf16.msra.mxu1 %v1325_v19  ;;  %1152 = vmatprep.subr.bf16.mxu0 %v1326_v20  ;;  %v1357_v59 = vld [vmem:[#allocation5 + $0x1a0] sm:$0xff]   ;;  %v1361_v63 = vld [vmem:[#allocation5 + $0x1a8] sm:$0xff]   ;;  %v1363_v1 = vld [vmem:[#allocation5 + $0x1f0] sm:$0xff]  }
  0x6f   : > { %1174 = vmatprep.subr.bf16.mxu1 %v1327_v21  ;;  %v1364_v2 = vld [vmem:[#allocation5 + $0x130] sm:$0xff]   ;;  %v1366_v4 = vld [vmem:[#allocation5 + $0x178] sm:$0xff]   ;;  %v240_v8 = vld [vmem:[%s1698_s4 + $0x28] sm:$0xff] }
  0x70   : > { %v1365_v3 = vld [vmem:[#allocation5 + $0x1b0] sm:$0xff]   ;;  %v1367_v5 = vld [vmem:[#allocation5 + $0x1f8] sm:$0xff]   ;;  %v248_v10 = vpack.c.bf16 %v240_v8, %v240_v8  ;;  %v239_v12 = vld [vmem:[%s1698_s4 + $0x20] sm:$0xff] }
  0x71   : > { %1153 = vmatpush3.bf16.msra.mxu0 %v1328_v22  ;;  %v1368_v6 = vld [vmem:[#allocation5 + $0x138] sm:$0xff]   ;;  %v241_v13 = vld [vmem:[%s1698_s4 + $0x30] sm:$0xff]  ;;  %v247_v14 = vpack.c.bf16 %v239_v12, %v239_v12 }
  0x72   : > { %1175 = vmatpush3.bf16.msra.mxu1 %v1329_v23  ;;  %1154 = vmatprep.subr.bf16.mxu0 %v1330_v24  ;;  %v1369_v7 = vld [vmem:[#allocation5 + $0x1b8] sm:$0xff]   ;;  %v249_v15 = vpack.c.bf16 %v241_v13, %v241_v13 }
  0x73   : > { %1176 = vmatprep.subr.bf16.mxu1 %v1331_v25  ;;  %v242_v9 = vld [vmem:[%s1698_s4 + $0x38] sm:$0xff] }
  0x74   : > { %v250_v11 = vpack.c.bf16 %v242_v9, %v242_v9 }
  0x75   : > { %1155 = vmatpush3.bf16.msra.mxu0 %v1332_v26 }
  0x76   : > { %1177 = vmatpush3.bf16.msra.mxu1 %v1333_v27  ;;  %1156 = vmatprep.subr.bf16.mxu0 %v1334_v28 }
  0x77   : > { %1178 = vmatprep.subr.bf16.mxu1 %v1335_v29 }
  0x79   : > { %1157 = vmatpush3.bf16.msra.mxu0 %v1336_v30 }
  0x7a   : > { %1179 = vmatpush3.bf16.msra.mxu1 %v1337_v31  ;;  %1186 = vmatprep.subr.bf16.mxu0 %v1338_v40 }
  0x7b   : > { %1208 = vmatprep.subr.bf16.mxu1 %v1339_v41 }
  0x7c   : > { %796 = vmatmul.mubr.bf16.vlgmr.msra.gmra.mrb[0].mxu0 %v243_v37 }
  0x7d   : > { %836 = vmatmul.mubr.bf16.vlgmr.msra.gmra.mrb[0].mxu1 %v245_v39  ;;  %1187 = vmatpush3.bf16.msra.mxu0 %v1340_v42  ;;  %v1136_v39 = vld [vmem:[%s1775_s2] ss:$0 sm:$0xff] }
  0x7e   : > { %1209 = vmatpush3.bf16.msra.mxu1 %v1341_v43  ;;  %1188 = vmatprep.subr.bf16.mxu0 %v1342_v44 }
  0x7f   : > { %1210 = vmatprep.subr.bf16.mxu1 %v1343_v45  ;;  %875 = vmatprep.mubr.bf16.mxu0 %v248_v10 }
  0x80   : > { %915 = vmatprep.mubr.bf16.mxu1 %v250_v11 }
  0x81   : > { %1189 = vmatpush3.bf16.msra.mxu0 %v1344_v46 }
  0x82   : > { %1211 = vmatpush3.bf16.msra.mxu1 %v1345_v47  ;;  %1190 = vmatprep.subr.bf16.mxu0 %v1346_v48 }
  0x83   : > { %1212 = vmatprep.subr.bf16.mxu1 %v1347_v49 }
  0x85   : > { %1191 = vmatpush3.bf16.msra.mxu0 %v1348_v50 }
  0x86   : > { %1213 = vmatpush3.bf16.msra.mxu1 %v1349_v51  ;;  %1192 = vmatprep.subr.bf16.mxu0 %v1350_v52 }
  0x87   : > { %1214 = vmatprep.subr.bf16.mxu1 %v1351_v53 }
  0x89   : > { %1193 = vmatpush3.bf16.msra.mxu0 %v1352_v54 }
  0x8a   : > { %1215 = vmatpush3.bf16.msra.mxu1 %v1353_v55  ;;  %1194 = vmatprep.subr.bf16.mxu0 %v1354_v56 }
  0x8b   : > { %1216 = vmatprep.subr.bf16.mxu1 %v1355_v57 }
  0x8d   : > { %1195 = vmatpush3.bf16.msra.mxu0 %v1356_v58 }
  0x8e   : > { %1217 = vmatpush3.bf16.msra.mxu1 %v1357_v59  ;;  %1196 = vmatprep.subr.bf16.mxu0 %v1358_v60 }
  0x8f   : > { %1218 = vmatprep.subr.bf16.mxu1 %v1359_v61 }
  0x91   : > { %1197 = vmatpush3.bf16.msra.mxu0 %v1360_v62 }
  0x92   : > { %1219 = vmatpush3.bf16.msra.mxu1 %v1361_v63  ;;  %1198 = vmatprep.subr.bf16.mxu0 %v1362_v0 }
  0x93   : > { %1220 = vmatprep.subr.bf16.mxu1 %v1363_v1 }
  0x95   : > { %1199 = vmatpush3.bf16.msra.mxu0 %v1364_v2 }
  0x96   : > { %1221 = vmatpush3.bf16.msra.mxu1 %v1365_v3  ;;  %1200 = vmatprep.subr.bf16.mxu0 %v1366_v4 }
  0x97   : > { %1222 = vmatprep.subr.bf16.mxu1 %v1367_v5 }
  0x99   : > { %1201 = vmatpush3.bf16.msra.mxu0 %v1368_v6 }
  0x9a   : > { %1223 = vmatpush3.bf16.msra.mxu1 %v1369_v7 }
  0x9c   : > { %876 = vmatmul.mubr.bf16.vlgmr.msra.gmra.mrb[4].mxu0 %v247_v14 }
  0x9d   : > { %916 = vmatmul.mubr.bf16.vlgmr.msra.gmra.mrb[4].mxu1 %v249_v15 }
 0x14f   : > { %v1158_v16 = vpop.f32.mrb[0].mxu0 }
 0x150   : > { %v1180_v17 = vpop.f32.mrb[0].mxu1  ;;  %v1159_v18 = vpop.f32.mrb[1].mxu0 }
 0x151   : > { %v1181_v19 = vpop.f32.mrb[1].mxu1  ;;  %v1160_v20 = vadd.f32 %v1159_v18, %v1158_v16  ;;  %v1161_v22 = vpop.f32.mrb[2].mxu0 }
 0x152   : > { %v1182_v21 = vadd.f32 %v1181_v19, %v1180_v17  ;;  %v1183_v23 = vpop.f32.mrb[2].mxu1  ;;  %v1162_v24 = vpop.f32.mrb[3].mxu0 }
 0x153   : > { %v1184_v25 = vpop.f32.mrb[3].mxu1 }
 0x154   : > { %v838_v26 = vadd.f32 %v1182_v21, %v1160_v20 }
 0x16f   : > { %v1202_v27 = vpop.f32.mrb[4].mxu0 }
 0x170   : > { %v1224_v28 = vpop.f32.mrb[4].mxu1  ;;  %v1203_v29 = vpop.f32.mrb[5].mxu0 }
 0x171   : > { %v1204_v30 = vadd.f32 %v1203_v29, %v1202_v27  ;;  %v1225_v31 = vpop.f32.mrb[5].mxu1  ;;  %v1205_v32 = vpop.f32.mrb[6].mxu0 }
 0x172   : > { %v1226_v33 = vadd.f32 %v1225_v31, %v1224_v28  ;;  %v1227_v34 = vpop.f32.mrb[6].mxu1  ;;  %v1206_v35 = vpop.f32.mrb[7].mxu0 }
 0x173   : > { %v878_v36 = vadd.f32 %v1204_v30, %v838_v26  ;;  %v1228_v37 = vpop.f32.mrb[7].mxu1 }
 0x175   : > { %v918_v38 = vadd.f32 %v1226_v33, %v878_v36 }
 0x177   : > { %v936_v40 = vadd.f32 %v1136_v39, %v918_v38 }
 0x179   : > { %v938_v41 = vand.u32 2147483647, %v936_v40  ;;  %v937_v52 = vmax.f32 %v936_v40, 0.0 }
 0x17b   : > { %v939_v42 = vsub.f32 0.0, %v938_v41 }
 0x17d   : > { %v940_v43 = vmul.f32 1.442695, %v939_v42 }
 0x17f   : > { %1370 = vpow2.f32 %v940_v43 }
 0x189   : > { %v1371_v44 = vpop.eup %1370 }
 0x18a   : > { %v942_v45 = vadd.f32 1.0, %v1371_v44  ;;  %v945_v46 = vmul.f32 -0.5, %v1371_v44  ;;  %v948_v48 = vand.u32 2147483647, %v1371_v44 }
 0x18c   : > { %1372 = vlog2.f32 %v942_v45  ;;  %v946_v47 = vadd.f32 1.0, %v945_v46  ;;  %vm949_vm0 = vcmp.lt.f32.partialorder %v948_v48, 0.0004427343 }
 0x18e   : > { %v947_v51 = vmul.f32 %v1371_v44, %v946_v47 }
 0x196   : > { %v1373_v49 = vpop.eup %1372 }
 0x197   : > { %v944_v50 = vmul.f32 0.6931472, %v1373_v49 }
 0x199   : > { %v950_v53 = vsel %vm949_vm0, %v947_v51, %v944_v50 }
 0x19a   : > { %v951_v54 = vadd.f32 %v950_v53, %v937_v52 }
 0x19c   : > { %952 = vst [vmem:[%s225_s10] sm:$0xff] %v951_v54 }
 0x19d   : > { %1445 = shalt.err (!%p1442_p5)
}
 0x19e   : > { %s1446_s19 = scalar_lea.hbm %s1724_s6, 128  ;;  %s1450_s4 = scalar_lea.hbm %s1776_s3, 256 }
 0x19f   : > { %p1447_p9 = scmp.ne.s32.totalorder %s1724_s6, %s1446_s19  ;;  %p1451_p7 = scmp.lt.u32.totalorder %s1724_s6, %s1776_s3 }
 0x1a0   : > { %p1452_p3 = scmp.lt.u32.totalorder %s1450_s4, %s1446_s19  ;;  %p1454_p4 = scmp.lt.u32.totalorder %s1446_s19, %s1724_s6 }
 0x1a1   : > { %p1448_p1 = pnand %p1447_p9, %p1641_p10 }
 0x1a2   : > { %p1453_p13 = por %p1452_p3, %p1451_p7 }
 0x1a3   : > { %p1449_p2 = pneg %p1448_p1 }
 0x1a4   : > { %p1455_p6 = por %p1454_p4, %p1453_p13 }
 0x1a6   : > { %p1456_p8 = pnand %p1455_p6, %p1449_p2 }
 0x1a8   : > { %1459 = shalt.err (!%p1456_p8)
}
 0x1a9   : > { %1236 = dma.vmem_to_hbm [thread:$0]  (%p1641_p10), %s1726_s11, 128, %s1724_s6, %s954_s26  }
 0x1aa PF: > { %s979_s24 = sand.u32 1, %s1498_s12   ;;  %p1794_p12 = scmp.ne.s32.totalorder %s1784_s23, 0 }
 0x1ab   : > { %p1795_p11 = scmp.ge.s32.totalorder %s1518_s17, 2  ;;  %s980_s9 = scalar_lea.sflag [#allocation4], %s979_s24 }
 0x1ad   : > { %p1247_p0 = pnand %p1795_p11, %p1794_p12 }
 0x1af   : > { %1493 = dma.done.wait (!%p1247_p0), %s980_s9, 128  }
 0x1b0   : > { %1495 = vsyncadd (!%p1247_p0), %s980_s9, 4294967168  ;;  %s20_s17 = sadd.s32 1, %s1518_s17   ;;  %s1796_s12 = smov %s1502_s13 }
 0x1b1   : > { %p17_p5 = scmp.ge.s32.totalorder %s20_s17, 4   ;;  %s1797_s13 = smov %s1506_s14 }
 0x1b2   : > { %s1798_s14 = smov %s1650_s5  ;;  %s1799_s15 = smov %s1514_s16 }
 0x1b3   : > { %s1800_s16 = smov %s1802_s28  ;;  %19 = sbr.rel (!%p17_p5) target bundleno = 7 (0x7), region = 90 }
 0x1ba   :  { %985 = vsyncpa [#allocation3], 1 }
 0x1bb   :  { %987 = vsyncpa [#allocation3 + $0x1], 1 }
 0x1bc   :  { %988 = vsyncpa [#allocation6], 1 }
 0x1bd   :  { %989 = vsyncpa [#allocation4], 1 }
 0x1be   :  { %991 = vsyncpa [#allocation4 + $0x1], 1 }

</bundles_post_ra>
